<compile_context>
chip_gen: v5e
topology: v5e:2x2
jax: 0.10.0
libtpu: 0.0.40
codegen_flags: <defaults>
</compile_context>

<pallas_src>
import numpy as np
import jax
import jax.numpy as jnp
from jax.experimental import pallas as pl
from jax.experimental.pallas import tpu as pltpu

EPS = 1e-5
HIGHEST = jax.lax.Precision.HIGHEST


# --------------------------------------------------------------------------
# pltpu.roll direction probe (robust to the lowered rotate convention)
# --------------------------------------------------------------------------

def _roll_probe_kernel(x_ref, o_ref):
    o_ref[...] = pltpu.roll(x_ref[...], shift=1, axis=1)


def detect_roll_direction():
    x = jax.lax.broadcasted_iota(jnp.float32, (8, 128), 1)
    y = pl.pallas_call(
        _roll_probe_kernel,
        out_shape=jax.ShapeDtypeStruct((8, 128), jnp.float32),
    )(x)
    y00 = int(round(float(np.asarray(y)[0, 0])))
    if y00 == 127:      # numpy-style roll: out[i] = in[i - shift]
        return 1
    if y00 == 1:        # opposite convention: out[i] = in[i + shift]
        return -1
    raise RuntimeError(f"unexpected pltpu.roll behaviour (probe got {y00})")


# --------------------------------------------------------------------------
# Fused branch kernel (one sample slab of Ls = T*V lanes per grid point)
# --------------------------------------------------------------------------

def make_branch_kernel(cfgs, T, V, TW, Ls, roll_dir):
    PAD = (TW - 1) // 2
    NC = Ls // 128                      # 128-lane chunks per sample slab

    def dotf(a, b):
        return jnp.dot(a, b, preferred_element_type=jnp.float32,
                       precision=HIGHEST)

    def kernel(x_ref, ablk_ref, *rest):
        out_ref = rest[-2]
        h_ref = rest[-1]                # VMEM scratch (TW*C_out_max, Ls) f32
        param_refs = rest[:-2]

        # Per-lane time coordinate (lane = t*V + v).  Multiplicative masks
        # implement SAME zero-padding in time and kill the roll wrap-around.
        # Computed once, reused by every module.
        t_lane = jax.lax.broadcasted_iota(jnp.int32, (1, Ls), 1) // V
        masks = {}
        for dt in range(TW):
            shift = dt - PAD
            if shift == 0:
                continue
            src_t = t_lane + shift
            masks[dt] = jnp.logical_and(src_t >= 0, src_t < T).astype(jnp.float32)

        x = x_ref[...].astype(jnp.float32)                    # (C_in, Ls)
        idx = 0
        for m, cfg in enumerate(cfgs):
            K, C_out, res = cfg["K"], cfg["C_out"], cfg["res"]
            w_gcn = param_refs[idx]
            w_tcn = param_refs[idx + 1]
            bias = param_refs[idx + 2]
            idx += 3
            r_w = None
            if res == "conv":
                r_w = param_refs[idx]
                idx += 1

            b_gcn = bias[0:K * C_out, :]
            scn_b = bias[K * C_out:K * C_out + C_out, :]
            b_tcn = bias[K * C_out + C_out:K * C_out + 2 * C_out, :]

            # ---- spatial graph conv -----------------------------------------
            # All K 1x1 convs at once: (K*C_out, C_in) @ (C_in, Ls).
            # (input BN + scn BN scales are folded into w_gcn / b_gcn.)
            y = dotf(w_gcn[...], x) + b_gcn                   # (K*C_out, Ls)

            # Block-diagonal adjacency kron(I_{128/V}, A_k), applied per
            # 128-lane chunk, accumulating over K (no concatenate / relayout).
            s_chunks = []
            for c in range(NC):
                acc = None
                for k in range(K):
                    yk = y[k * C_out:(k + 1) * C_out, c * 128:(c + 1) * 128]
                    Ak = ablk_ref[(m * K + k) * 128:(m * K + k + 1) * 128, :]
                    part = dotf(yk, Ak)
                    acc = part if acc is None else acc + part
                s_chunks.append(acc)
            s = s_chunks[0] if NC == 1 else jnp.concatenate(s_chunks, axis=1)
            h = jnp.maximum(s + scn_b, 0.0)                   # (C_out, Ls)

            # ---- temporal (TW x 1) conv -------------------------------------
            # Shifted copies via lane roll + edge mask, written into the VMEM
            # scratch slab; then ONE matmul with contraction TW*C_out.
            for dt in range(TW):
                shift = dt - PAD
                if shift == 0:
                    col = h
                else:
                    amt = (-roll_dir * shift * V) % Ls
                    col = pltpu.roll(h, shift=amt, axis=1) * masks[dt]
                h_ref[dt * C_out:(dt + 1) * C_out, :] = col
            t_out = dotf(w_tcn[...], h_ref[0:TW * C_out, :]) + b_tcn

            # ---- module residual + ReLU -------------------------------------
            if res == "identity":
                t_out = t_out + x
            elif res == "conv":
                r_b = bias[K * C_out + 2 * C_out:K * C_out + 3 * C_out, :]
                t_out = t_out + dotf(r_w[...], x) + r_b
            x = jnp.maximum(t_out, 0.0)

        out_ref[...] = x.astype(out_ref.dtype)

    return kernel


def make_branch_forward(cfgs, N, T, V, TW, roll_dir):
    Ls = T * V
    assert 128 % V == 0 and Ls % 128 == 0
    assert ((TW - 1) // 2) * V < Ls
    C_last = cfgs[-1]["C_out"]
    C_out_max = max(c["C_out"] for c in cfgs)
    kernel = make_branch_kernel(cfgs, T, V, TW, Ls, roll_dir)

    def forward(x_nctv, *flat_params):
        C_in = x_nctv.shape[1]
        # (N, C, T, V) -> (C, N*T*V): channels on sublanes, lane = n*T*V + t*V + v.
        x2d = jnp.transpose(x_nctv, (1, 0, 2, 3)).reshape(C_in, N * Ls)

        def param_spec(a):
            # Constant block index -> DMA'd once, reused across the batch grid.
            return pl.BlockSpec(a.shape, lambda n, nd=a.ndim: (0,) * nd)

        in_specs = ([pl.BlockSpec((C_in, Ls), lambda n: (0, n))]
                    + [param_spec(a) for a in flat_params])

        out2d = pl.pallas_call(
            kernel,
            out_shape=jax.ShapeDtypeStruct((C_last, N * Ls), jnp.float32),
            grid=(N,),
            in_specs=in_specs,
            out_specs=pl.BlockSpec((C_last, Ls), lambda n: (0, n)),
            scratch_shapes=[pltpu.VMEM((TW * C_out_max, Ls), jnp.float32)],
            compiler_params=pltpu.CompilerParams(
                dimension_semantics=("parallel",),
                vmem_limit_bytes=32 * 1024 * 1024,
            ),
        )(x2d, *flat_params)
        return jnp.transpose(out2d.reshape(C_last, N, T, V), (1, 0, 2, 3))

    return jax.jit(forward)


# --------------------------------------------------------------------------
# One-time parameter packing (eval-mode BN folds, blocked adjacency, coalesced
# bias slabs).  Runs once, outside the forward path.
# --------------------------------------------------------------------------

def pack_branch_params(params, A, V, TW):
    K = A.shape[0]
    R = 128 // V                                             # joint groups / 128 lanes
    assert params["modules"][0]["res"] == "zero"             # initial=True -> no residual
    bn_scale = params["bn_scale"].astype(jnp.float32)
    bn_bias = params["bn_bias"].astype(jnp.float32)
    eye_r = jnp.eye(R, dtype=jnp.float32)

    cfgs, flat, ablk_rows = [], [], []
    first = True
    for p in params["modules"]:
        Kk, C_out, C_in = p["gcn_w"].shape
        A_eff = A * p["edge"]                                # A * self.edge
        for k in range(Kk):
            ablk_rows.append(jnp.kron(eye_r, A_eff[k]))      # (128, 128)

        gs = p["scn_scale"]
        W = p["gcn_w"] * gs[None, :, None]                   # fold scn BN scale
        b = p["gcn_b"] * gs[None, :]
        if first:                                            # fold input BatchNorm2d
            b = b + jnp.einsum("koc,c->ko", W, bn_bias)
            W = W * bn_scale[None, None, :]
            first = False

        ts = p["tcn_scale"]
        w_tcn = (p["tcn_w"] * ts[None, :, None]).transpose(1, 0, 2)
        w_tcn = w_tcn.reshape(C_out, TW * C_out)             # fold tcn BN scale
        b_tcn = ts * p["tcn_b"] + p["tcn_bias"]

        mod = [W.reshape(Kk * C_out, C_in).astype(jnp.float32),
               w_tcn.astype(jnp.float32)]
        bias_rows = [b.reshape(Kk * C_out), p["scn_bias"], b_tcn]
        res_w = None
        if p["res"] == "conv":
            rs = p["res_scale"]
            res_w = (p["res_w"] * rs[:, None]).astype(jnp.float32)
            bias_rows.append(rs * p["res_b"] + p["res_bias"])
        mod.append(jnp.concatenate(bias_rows).reshape(-1, 1).astype(jnp.float32))
        if res_w is not None:
            mod.append(res_w)

        flat += mod
        cfgs.append(dict(K=Kk, C_in=C_in, C_out=C_out, res=p["res"]))

    # All modules' blocked adjacencies as ONE (M*K*128, 128) f32 slab.
    Ablk = jnp.concatenate(ablk_rows, axis=0).astype(jnp.float32)
    return cfgs, tuple([Ablk] + flat)


# --------------------------------------------------------------------------
# Pure-NumPy (float64) reference of the original semantics (un-folded params)
# --------------------------------------------------------------------------

def ref_forward_np(x, A, params, TW=9):
    f = lambda a: np.asarray(a, np.float64)
    x = f(x); A = f(A)
    PAD = (TW - 1) // 2
    out = (x * f(params["bn_scale"])[None, :, None, None]
           + f(params["bn_bias"])[None, :, None, None])
    for p in params["modules"]:
        N, _, T, V = out.shape
        C_out = p["gcn_w"].shape[1]
        A_eff = A * f(p["edge"])
        y = (np.einsum("koc,nctv->nkotv", f(p["gcn_w"]), out)
             + f(p["gcn_b"])[None, :, :, None, None])
        s = np.einsum("nkotv,kvw->notw", y, A_eff)
        s = (s * f(p["scn_scale"])[None, :, None, None]
             + f(p["scn_bias"])[None, :, None, None])
        h = np.maximum(s, 0.0)
        hp = np.pad(h, ((0, 0), (0, 0), (PAD, PAD), (0, 0)))
        t = np.zeros((N, C_out, T, V))
        for dt in range(TW):
            t += np.einsum("oc,nctv->notv", f(p["tcn_w"])[dt], hp[:, :, dt:dt + T, :])
        t = t + f(p["tcn_b"])[None, :, None, None]
        t = (t * f(p["tcn_scale"])[None, :, None, None]
             + f(p["tcn_bias"])[None, :, None, None])
        if p["res"] == "identity":
            res = out
        elif p["res"] == "conv":
            r = (np.einsum("oc,nctv->notv", f(p["res_w"]), out)
                 + f(p["res_b"])[None, :, None, None])
            res = (r * f(p["res_scale"])[None, :, None, None]
                   + f(p["res_bias"])[None, :, None, None])
        else:
            res = 0.0
        out = np.maximum(t + res, 0.0)
    return out


# --------------------------------------------------------------------------
# Deterministic parameter init (eval-mode BN pre-folded into scale/bias)
# --------------------------------------------------------------------------

def folded_bn(key, C):
    k1, k2, k3, k4 = jax.random.split(key, 4)
    gamma = jax.random.uniform(k1, (C,), jnp.float32, 0.5, 1.5)
    beta = 0.1 * jax.random.normal(k2, (C,), jnp.float32)
    mean = 0.1 * jax.random.normal(k3, (C,), jnp.float32)
    var = jax.random.uniform(k4, (C,), jnp.float32, 0.5, 1.5)
    scale = gamma / jnp.sqrt(var + EPS)
    bias = beta - mean * scale
    return scale, bias


def init_module_params(key, c_in, c_out, res_mode, K, V, TW):
    ks = jax.random.split(key, 9)
    b1 = 1.0 / np.sqrt(c_in)
    b2 = 1.0 / np.sqrt(c_out * TW)
    p = dict(
        res=res_mode,
        edge=jnp.ones((K, V, V), jnp.float32),   # nn.Parameter(torch.ones_like(A))
        gcn_w=jax.random.uniform(ks[0], (K, c_out, c_in), jnp.float32, -b1, b1),
        gcn_b=jax.random.uniform(ks[1], (K, c_out), jnp.float32, -b1, b1),
        tcn_w=jax.random.uniform(ks[2], (TW, c_out, c_out), jnp.float32, -b2, b2),
        tcn_b=jax.random.uniform(ks[3], (c_out,), jnp.float32, -b2, b2),
    )
    p["scn_scale"], p["scn_bias"] = folded_bn(ks[4], c_out)
    p["tcn_scale"], p["tcn_bias"] = folded_bn(ks[5], c_out)
    if res_mode == "conv":
        p["res_w"] = jax.random.uniform(ks[6], (c_out, c_in), jnp.float32, -b1, b1)
        p["res_b"] = jax.random.uniform(ks[7], (c_out,), jnp.float32, -b1, b1)
        p["res_scale"], p["res_bias"] = folded_bn(ks[8], c_out)
    return p


def init_branch_params(key, num_channel, structure, block, K, V, TW):
    assert block == "Basic"  # TODO(synk): Bottleneck block variant not translated.
    # Module list exactly as in ResGCN_Input_Branch.__init__
    cfgs = [(num_channel, 64, "zero")]                       # initial=True -> no residual
    cfgs += [(64, 64, "zero")] * (structure[0] - 1)          # initial=True
    cfgs += [(64, 64, "identity")] * (structure[1] - 1)      # Basic -> identity residual
    cfgs += [(64, 32, "conv")]                               # 64->32 -> conv1x1 + BN residual
    key, kb = jax.random.split(key)
    params = {}
    params["bn_scale"], params["bn_bias"] = folded_bn(kb, num_channel)
    mods = []
    for (ci, co, rm) in cfgs:
        key, kk = jax.random.split(key)
        mods.append(init_module_params(kk, ci, co, rm, K, V, TW))
    params["modules"] = mods
    return params


# --------------------------------------------------------------------------
# main
# --------------------------------------------------------------------------

if __name__ == "__main__":
    N, num_channel, T, V = 2, 4, 16, 16       # (batch, channels, frames, joints)
    K, TW = 3, 9                              # spatial kernel count, temporal window
    structure = (1, 2)                        # structure[0], structure[1] used here

    root = jax.random.PRNGKey(0)
    kx, ka, kp = jax.random.split(root, 3)
    x = jax.random.normal(kx, (N, num_channel, T, V), jnp.float32)
    A = jax.random.uniform(ka, (K, V, V), jnp.float32)
    params = init_branch_params(kp, num_channel, structure, "Basic", K, V, TW)

    roll_dir = detect_roll_direction()

    # Packing (BN folds, blocked adjacency, bias coalescing) runs ONCE.
    cfgs, flat_params = pack_branch_params(params, A, V, TW)
    forward = make_branch_forward(cfgs, N, T, V, TW, roll_dir)

    out = jax.block_until_ready(forward(x, *flat_params))
    assert out.shape == (N, 32, T, V), out.shape

    # f32 operands with HIGHEST matmul precision vs a float64 reference.
    ref = ref_forward_np(x, A, params, TW=TW)
    np.testing.assert_allclose(np.asarray(out), ref, rtol=5e-3, atol=5e-3)
    print("KERNEL_OK")
</pallas_src>

<mosaic_0001>
module attributes {stable_mosaic.version = 11 : i64} {
  func.func @_roll_probe_kernel(%arg0: memref<8x128xf32, #tpu.memory_space<vmem>>, %arg1: memref<8x128xf32, #tpu.memory_space<vmem>>) attributes {dimension_semantics = [], scalar_prefetch = 0 : i64, scratch_operands = 0 : i64, tpu.core_type = #tpu.core_type<tc>} {
    %c0 = arith.constant 0 : index
    %c0_0 = arith.constant 0 : index
    %0 = vector.load %arg0[%c0, %c0_0] : memref<8x128xf32, #tpu.memory_space<vmem>>, vector<8x128xf32>
    %c1_i32 = arith.constant 1 : i32
    %1 = tpu.dynamic_rotate %0 by %c1_i32 dim 1 : vector<8x128xf32>, i32 -> vector<8x128xf32>
    %c0_1 = arith.constant 0 : index
    %c0_2 = arith.constant 0 : index
    %2 = vector.load %arg1[%c0_1, %c0_2] : memref<8x128xf32, #tpu.memory_space<vmem>>, vector<8x128xf32>
    tpu.vector_store %arg1[%c0_1, %c0_2], %1 {strides = array<i32>} : memref<8x128xf32, #tpu.memory_space<vmem>>, vector<8x128xf32>,
    return
  }
}

</mosaic_0001>

<bundles_post_ra>
// kernel: tpu_custom_call.1
= control target key start
LH: loop header
LB: loop body
LE: loop exit
PB: predicated region body
PF: predicated region fallthrough
CT: control target
= control target key end

     0   :  { %6 = vsyncpa [#allocation3], 0  ;;  %s118_s0 = inlined_call_operand.hbm [shape: f32[8,128], index: 0, kind: input, shape index: {}]   ;;  %s119_s1 = inlined_call_operand.hbm [shape: f32[8,128], index: 1, kind: output, shape index: {}]  }
   0x1   :  { %7 = vsyncpa [#allocation4], 0  ;;  %s13_s8 = sshll.u32 %s118_s0, 4  ;;  %s99_s9 = smov [#allocation2]   ;;  %s14_s8 = int_to_ptr.hbm [resolvable:$true] %s13_s8 }
   0x2   :  { %s15_s10 = sshll.u32 %s99_s9, 4  ;;  %s16_s10 = int_to_ptr.vmem [resolvable:$true] %s15_s10 }
   0x3   :  { %18 = dma.hbm_to_vmem [thread:$0]  %s14_s8, 128, %s16_s10, [#allocation3]  }
   0x4   :  { %95 = dma.done.wait [#allocation3], 128  }
   0x5   :  { %96 = vsyncadd [#allocation3], 4294967168  ;;  %v23_v0 = vld [vmem:[#allocation2] sm:$0xff]  ;;  %s100_s11 = smov 1   ;;  %s101_s12 = smov [#allocation5]  }
   0x6   :  { %24 = vrot.lane.b32.xlu0 %v23_v0, %s100_s11  ;;  %s32_s13 = sshll.u32 %s101_s12, 4  ;;  %s34_s16 = sshll.u32 %s119_s1, 4  ;;  %s33_s13 = int_to_ptr.vmem [resolvable:$true] %s32_s13  ;;  %s35_s16 = int_to_ptr.hbm [resolvable:$true] %s34_s16 }
  0x78   :  { %v25_v1 = vpop.permute.xlu0 %24 }
  0x79   :  { %26 = vst [vmem:[#allocation5] sm:$0xff] %v25_v1 }
  0x7a   :  { %37 = dma.vmem_to_hbm [thread:$0]  %s33_s13, 128, %s35_s16, [#allocation4]  }
  0x7b   :  { %97 = dma.done.wait [#allocation4], 128  }
  0x7c   :  { %98 = vsyncadd [#allocation4], 4294967168 }
  0x7d   :  { %42 = vsyncpa [#allocation3], 1 }
  0x7e   :  { %43 = vsyncpa [#allocation4], 1 }

</bundles_post_ra>
